<compile_context>
chip_gen: v5e
topology: v5e:2x2
jax: 0.10.0
libtpu: 0.0.40
codegen_flags: <defaults>
</compile_context>

<pallas_src>
import functools

import jax
import jax.numpy as jnp
from jax.experimental import pallas as pl
from jax.experimental.pallas import tpu as pltpu

_LANES = 128
_MAX_TR = 128                          # 128 rows * 128 lanes = 16384 pixels per grid step
_VMEM_TILE_BUDGET = 16 * 1024 * 1024   # bytes per grid step (pipeline buffers + temporaries)


def _choose_tr(num_classes, rows):
    """Sublane rows per tile (lane width fixed at 128).

    VMEM per grid step, f32 bytes/row ~= 512 * (2*C [double-buffered score]
    + ~3.5*C [in-kernel temporaries: exp, iota, masked-sum] + ~10 [target/outputs]).
    Cap at 128 rows (16K pixels): already >=85% of streaming roofline and keeps many
    grid tiles for 2-TensorCore megacore balance on v7x (64 MiB VMEM).
    """
    tr = int(_VMEM_TILE_BUDGET // (512 * (5.5 * num_classes + 10)))
    tr = max(8, (tr // 8) * 8)
    tr = min(tr, _MAX_TR)
    return rows if rows <= tr else tr


# ----------------------------------------------------------------------------------------
# Pallas kernel: per-pixel cross entropy (+ softmax prob at target, + fused OHEM stats).
#   score block: (C, TR, 128)   target block: (TR, 128) int32
#   optional outputs (in this order):
#     loss  (TR, 128) f32 (0 for ignored pixels)
#     pred  (TR, 128) f32 (+inf for ignored pixels)
#     stats (4, 128)  f32: per-lane partial sums of
#            [ sum(loss | valid & pred<thresh), #(valid & pred<thresh),
#              #(valid & pred<=thresh),          #valid ]
# ----------------------------------------------------------------------------------------
def _ce_kernel(score_ref, tgt_ref, *out_refs, ignore_label, thresh,
               want_loss, want_pred, want_stats):
    s = score_ref[...].astype(jnp.float32)                     # (C, TR, 128)
    t = tgt_ref[...]                                            # (TR, 128) int32

    m = jnp.max(s, axis=0)                                      # (TR, 128)  VALU over C planes
    lse = m + jnp.log(jnp.sum(jnp.exp(s - m), axis=0))          # (TR, 128)

    valid = t != ignore_label                                   # (TR, 128) bool
    tt = jnp.where(valid, t, 0)                                 # ignore -> class 0
    cls = jax.lax.broadcasted_iota(jnp.int32, s.shape, 0)       # (C, TR, 128)
    s_at_t = jnp.sum(jnp.where(cls == tt, s, 0.0), axis=0)      # (TR, 128)

    loss_raw = lse - s_at_t                                     # -log softmax[target]

    o = 0
    if want_loss:
        out_refs[o][...] = jnp.where(valid, loss_raw, 0.0)
        o += 1
    if want_pred or want_stats:
        pred = jnp.exp(-loss_raw)                               # softmax prob at target class
    if want_pred:
        out_refs[o][...] = jnp.where(valid, pred, jnp.inf)
        o += 1
    if want_stats:
        stats_ref = out_refs[o]
        lt = jnp.logical_and(valid, pred < thresh)
        le = jnp.logical_and(valid, pred <= thresh)
        stats_ref[0:1, :] = jnp.sum(jnp.where(lt, loss_raw, 0.0), axis=0, keepdims=True)
        stats_ref[1:2, :] = jnp.sum(lt.astype(jnp.float32), axis=0, keepdims=True)
        stats_ref[2:3, :] = jnp.sum(le.astype(jnp.float32), axis=0, keepdims=True)
        stats_ref[3:4, :] = jnp.sum(valid.astype(jnp.float32), axis=0, keepdims=True)


def _run_ce_kernel(score_ncrl, target_nrl, *, ignore_label, thresh, tr,
                   want_loss, want_pred, want_stats):
    N, C, R, L = score_ncrl.shape
    assert L == _LANES and R % tr == 0
    T = R // tr

    pix_spec = pl.BlockSpec((None, tr, L), lambda n, t: (n, t, 0))
    out_shapes, out_specs = [], []
    if want_loss:
        out_shapes.append(jax.ShapeDtypeStruct((N, R, L), jnp.float32))
        out_specs.append(pix_spec)
    if want_pred:
        out_shapes.append(jax.ShapeDtypeStruct((N, R, L), jnp.float32))
        out_specs.append(pix_spec)
    if want_stats:
        out_shapes.append(jax.ShapeDtypeStruct((N, T, 4, L), jnp.float32))
        out_specs.append(pl.BlockSpec((None, None, 4, L), lambda n, t: (n, t, 0, 0)))

    kern = functools.partial(_ce_kernel, ignore_label=ignore_label, thresh=float(thresh),
                             want_loss=want_loss, want_pred=want_pred, want_stats=want_stats)
    return pl.pallas_call(
        kern,
        out_shape=tuple(out_shapes),
        grid=(N, T),
        in_specs=[
            pl.BlockSpec((None, C, tr, L), lambda n, t: (n, 0, t, 0)),
            pl.BlockSpec((None, tr, L), lambda n, t: (n, t, 0)),
        ],
        out_specs=tuple(out_specs),
        compiler_params=pltpu.CompilerParams(
            dimension_semantics=("parallel", "parallel"),
            vmem_limit_bytes=32 * 1024 * 1024,
        ),
    )(score_ncrl, target_nrl)


# ----------------------------------------------------------------------------------------
# Module wrapper
# ----------------------------------------------------------------------------------------
class OhemCrossEntropy:
    def __init__(self, ignore_label=-1, thres=0.7, weight=None,
                 n_img_per_gpu=6, cropsize=(1024, 512), min_kept=None):
        # TODO(synk): per-class `weight` vector is not supported (reference default is None).
        self.thresh = float(thres)
        self.min_kept = n_img_per_gpu * cropsize[0] * cropsize[1] // 16
        self.ignore_label = ignore_label

    # ----- plumbing: NCHW -> (N, C, R, 128) + (N, R, 128); pad pixel axis once if ragged ----
    def _prepare(self, score, target):
        N, C, H, W = score.shape
        HW = H * W
        R = pl.cdiv(HW, _LANES)
        tr = _choose_tr(C, R)
        T = pl.cdiv(R, tr)
        R_pad = T * tr
        HW_pad = R_pad * _LANES
        s = score.reshape(N, C, HW)
        t = target.reshape(N, HW).astype(jnp.int32)
        if HW_pad != HW:
            s = jnp.pad(s, ((0, 0), (0, 0), (0, HW_pad - HW)))
            t = jnp.pad(t, ((0, 0), (0, HW_pad - HW)), constant_values=self.ignore_label)
        return s.reshape(N, C, R_pad, _LANES), t.reshape(N, R_pad, _LANES), tr

    def _ce_forward(self, score, target):
        N, C, H, W = score.shape
        HW = H * W
        s, t, tr = self._prepare(score, target)
        (loss,) = _run_ce_kernel(s, t, ignore_label=self.ignore_label, thresh=self.thresh,
                                 tr=tr, want_loss=True, want_pred=False, want_stats=False)
        return loss.reshape(N, -1)[:, :HW].reshape(N, H, W)

    def _ohem_forward(self, score, target):
        N, C, H, W = score.shape
        HW = H * W
        P = N * HW
        s, t, tr = self._prepare(score, target)

        # Single streaming pass: only the fused statistics leave the kernel (no loss/pred maps).
        (stats,) = _run_ce_kernel(s, t, ignore_label=self.ignore_label, thresh=self.thresh,
                                  tr=tr, want_loss=False, want_pred=False, want_stats=True)
        tot = jnp.sum(stats, axis=(0, 1, 3))           # (4,) — counts exact in f32 up to 2^24 pixels
        sum_loss_lt, cnt_lt, cnt_le, n_valid = tot[0], tot[1], tot[2], tot[3]

        # k = index of the threshold element, as in torch: min(min_kept, numel(valid) - 1)
        k = jnp.clip(jnp.minimum(jnp.float32(self.min_kept), n_valid - 1.0), 0.0, float(P - 1))

        def _fast(_):
            # >= k+1 valid preds are <= thresh  =>  k-th smallest <= thresh  =>  threshold == thresh.
            # NOTE: empty keep-set yields NaN, matching torch's mean of an empty tensor.
            return sum_loss_lt / cnt_lt

        def _slow(_):
            # Rare path: the exact k-th smallest pred exceeds thresh. Recompute loss/pred maps
            # (they are not written in the common path) and select via a full sort.
            # TODO(synk): a histogram-based k-th-smallest selection would avoid the full sort.
            loss, pred = _run_ce_kernel(s, t, ignore_label=self.ignore_label, thresh=self.thresh,
                                        tr=tr, want_loss=True, want_pred=True, want_stats=False)
            loss = loss.reshape(-1)
            pred = pred.reshape(-1)                     # ignored / padded pixels carry +inf sentinel
            kk = jnp.clip(jnp.minimum(jnp.int32(self.min_kept), n_valid.astype(jnp.int32) - 1),
                          0, pred.shape[0] - 1)
            threshold = jnp.maximum(jnp.sort(pred)[kk], jnp.float32(self.thresh))
            keep = (pred < threshold).astype(jnp.float32)   # +inf sentinel is never kept
            return jnp.sum(loss * keep) / jnp.sum(keep)

        return jax.lax.cond(cnt_le > k, _fast, _slow, 0)

    def __call__(self, score, target):
        if not isinstance(score, (list, tuple)):
            score = [score]
        balance_weights = [0.4, 1.0]
        sb_weights = 1.0
        if len(balance_weights) == len(score):
            functions = [self._ce_forward] * (len(balance_weights) - 1) + [self._ohem_forward]
            return sum(w * f(x, target) for w, x, f in zip(balance_weights, score, functions))
        elif len(score) == 1:
            return sb_weights * self._ohem_forward(score[0], target)
        else:
            raise ValueError("lengths of prediction and target are not identical!")


# ----------------------------------------------------------------------------------------
# Pure-JAX references (for correctness checks)
# ----------------------------------------------------------------------------------------
def reference_ohem(score, target, ignore_label, thresh, min_kept):
    N, C, H, W = score.shape
    logits = jnp.transpose(score, (1, 0, 2, 3)).reshape(C, -1).astype(jnp.float32)
    t = target.reshape(-1)
    valid = t != ignore_label
    tt = jnp.where(valid, t, 0)
    logp = jax.nn.log_softmax(logits, axis=0)
    idx = jnp.arange(t.shape[0])
    losses = jnp.where(valid, -logp[tt, idx], 0.0)
    pred = jnp.exp(logp[tt, idx])
    pred_v = jnp.where(valid, pred, jnp.inf)
    sorted_pred = jnp.sort(pred_v)
    n_valid = jnp.sum(valid.astype(jnp.int32))
    k = jnp.clip(jnp.minimum(jnp.int32(min_kept), n_valid - 1), 0, t.shape[0] - 1)
    threshold = jnp.maximum(sorted_pred[k], jnp.float32(thresh))
    keep = (valid & (pred < threshold)).astype(jnp.float32)
    return jnp.sum(losses * keep) / jnp.sum(keep)


def reference_ce_map(score, target, ignore_label):
    logp = jax.nn.log_softmax(score.astype(jnp.float32), axis=1)
    t = jnp.clip(target, 0, score.shape[1] - 1)
    ce = -jnp.take_along_axis(logp, t[:, None, :, :], axis=1)[:, 0]
    return jnp.where(target != ignore_label, ce, 0.0)


if __name__ == "__main__":
    key = jax.random.PRNGKey(0)
    N, C, H, W = 2, 4, 16, 16
    k1, k2, k3 = jax.random.split(key, 3)
    score = jax.random.normal(k1, (N, C, H, W), dtype=jnp.float32)
    target = jax.random.randint(k2, (N, H, W), 0, C, dtype=jnp.int32)
    ign = jax.random.uniform(k3, (N, H, W)) < 0.1          # sprinkle some ignore_label pixels
    target = jnp.where(ign, -1, target)

    crit = OhemCrossEntropy(ignore_label=-1, thres=0.7, n_img_per_gpu=2, cropsize=(H, W))

    # 1) single-head OHEM path (fast, sort-free threshold path using fused in-kernel stats)
    loss = jax.block_until_ready(crit(score, target))
    ref = reference_ohem(score, target, -1, 0.7, crit.min_kept)
    assert jnp.allclose(loss, ref, rtol=1e-4, atol=1e-5), (loss, ref)

    # 2) confident logits -> exercises the sort-fallback threshold branch
    onehot = jax.nn.one_hot(jnp.clip(target, 0, C - 1), C, axis=1, dtype=jnp.float32)
    score2 = score + 6.0 * onehot
    loss2 = jax.block_until_ready(crit(score2, target))
    ref2 = reference_ohem(score2, target, -1, 0.7, crit.min_kept)
    assert jnp.allclose(loss2, ref2, rtol=1e-4, atol=1e-5), (loss2, ref2)

    # 3) two-head path: 0.4 * per-pixel CE map + 1.0 * OHEM scalar (broadcasts to (N,H,W))
    loss3 = jax.block_until_ready(crit([score, score2], target))
    ref3 = 0.4 * reference_ce_map(score, target, -1) + 1.0 * ref2
    assert loss3.shape == (N, H, W)
    assert jnp.allclose(loss3, ref3, rtol=1e-4, atol=1e-4), (loss3, ref3)

    # 4) C=19 (not a multiple of 8) and HW = 9*15 = 135 (not a multiple of 128): padded/ragged path
    N4, C4, H4, W4 = 2, 19, 9, 15
    k4, k5, k6 = jax.random.split(jax.random.PRNGKey(1), 3)
    score4 = jax.random.normal(k4, (N4, C4, H4, W4), dtype=jnp.float32)
    target4 = jax.random.randint(k5, (N4, H4, W4), 0, C4, dtype=jnp.int32)
    target4 = jnp.where(jax.random.uniform(k6, (N4, H4, W4)) < 0.1, -1, target4)
    crit4 = OhemCrossEntropy(ignore_label=-1, thres=0.7, n_img_per_gpu=N4, cropsize=(H4, W4))
    loss4 = jax.block_until_ready(crit4([score4, score4], target4))
    ref4 = (0.4 * reference_ce_map(score4, target4, -1)
            + 1.0 * reference_ohem(score4, target4, -1, 0.7, crit4.min_kept))
    assert jnp.allclose(loss4, ref4, rtol=1e-4, atol=1e-4), (loss4, ref4)

    # 5) bf16 logits (kernel casts to f32 internally); 64x64 so the sublane tile is 16-aligned
    N5, C5, H5, W5 = 2, 4, 64, 64
    k7, k8 = jax.random.split(jax.random.PRNGKey(2), 2)
    score5 = jax.random.normal(k7, (N5, C5, H5, W5), dtype=jnp.bfloat16)
    target5 = jax.random.randint(k8, (N5, H5, W5), 0, C5, dtype=jnp.int32)
    crit5 = OhemCrossEntropy(ignore_label=-1, thres=0.7, n_img_per_gpu=N5, cropsize=(H5, W5))
    loss5 = jax.block_until_ready(crit5(score5, target5))
    ref5 = reference_ohem(score5.astype(jnp.float32), target5, -1, 0.7, crit5.min_kept)
    assert jnp.allclose(loss5, ref5, rtol=1e-3, atol=1e-4), (loss5, ref5)

    print("KERNEL_OK")
</pallas_src>

<mosaic_0001>
module attributes {stable_mosaic.version = 11 : i64} {
  func.func @_ce_kernel(%arg0: i32, %arg1: i32, %arg2: memref<1x4x2x128xf32, #tpu.memory_space<vmem>>, %arg3: memref<1x2x128xi32, #tpu.memory_space<vmem>>, %arg4: memref<1x1x4x128xf32, #tpu.memory_space<vmem>>) attributes {dimension_semantics = [#tpu.dimension_semantics<parallel>, #tpu.dimension_semantics<parallel>], iteration_bounds = array<i64: 2, 1>, scalar_prefetch = 0 : i64, scratch_operands = 0 : i64, tpu.core_type = #tpu.core_type<tc>, window_params = [{transform_indices = @transform_0, window_bounds = array<i64: 1, 4, 2, 128>}, {transform_indices = @transform_1, window_bounds = array<i64: 1, 2, 128>}, {transform_indices = @transform_2, window_bounds = array<i64: 1, 1, 4, 128>}]} {
    %c0 = arith.constant 0 : index
    %c0_0 = arith.constant 0 : index
    %c0_1 = arith.constant 0 : index
    %c0_2 = arith.constant 0 : index
    %0 = vector.load %arg2[%c0, %c0_0, %c0_1, %c0_2] : memref<1x4x2x128xf32, #tpu.memory_space<vmem>>, vector<1x4x2x128xf32>
    %1 = vector.shape_cast %0 : vector<1x4x2x128xf32> to vector<4x2x128xf32>
    %c0_3 = arith.constant 0 : index
    %c0_4 = arith.constant 0 : index
    %c0_5 = arith.constant 0 : index
    %2 = vector.load %arg3[%c0_3, %c0_4, %c0_5] : memref<1x2x128xi32, #tpu.memory_space<vmem>>, vector<1x2x128xi32>
    %3 = vector.shape_cast %2 : vector<1x2x128xi32> to vector<2x128xi32>
    %cst = arith.constant dense<0xFF800000> : vector<2x128xf32>
    %4 = vector.multi_reduction <maximumf>, %1, %cst [0] : vector<4x2x128xf32> to vector<2x128xf32>
    %5 = vector.shape_cast %4 : vector<2x128xf32> to vector<1x2x128xf32>
    %6 = vector.broadcast %5 : vector<1x2x128xf32> to vector<4x2x128xf32>
    %7 = arith.subf %1, %6 : vector<4x2x128xf32>
    %8 = math.exp %7 : vector<4x2x128xf32>
    %cst_6 = arith.constant dense<0.000000e+00> : vector<2x128xf32>
    %9 = vector.multi_reduction <add>, %8, %cst_6 [0] : vector<4x2x128xf32> to vector<2x128xf32>
    %10 = math.log %9 : vector<2x128xf32>
    %11 = arith.addf %4, %10 : vector<2x128xf32>
    %c-1_i32 = arith.constant -1 : i32
    %12 = vector.broadcast %c-1_i32 : i32 to vector<2x128xi32>
    %13 = arith.cmpi ne, %3, %12 : vector<2x128xi32>
    %c0_i32 = arith.constant 0 : i32
    %14 = vector.broadcast %c0_i32 : i32 to vector<2x128xi32>
    %15 = arith.select %13, %3, %14 : vector<2x128xi1>, vector<2x128xi32>
    %16 = tpu.iota {dimensions = array<i32: 0>} : vector<4x2x128xi32>
    %17 = vector.shape_cast %15 : vector<2x128xi32> to vector<1x2x128xi32>
    %18 = vector.broadcast %17 : vector<1x2x128xi32> to vector<4x2x128xi32>
    %19 = arith.cmpi eq, %16, %18 : vector<4x2x128xi32>
    %cst_7 = arith.constant 0.000000e+00 : f32
    %20 = vector.broadcast %cst_7 : f32 to vector<4x2x128xf32>
    %21 = arith.select %19, %1, %20 : vector<4x2x128xi1>, vector<4x2x128xf32>
    %cst_8 = arith.constant dense<0.000000e+00> : vector<2x128xf32>
    %22 = vector.multi_reduction <add>, %21, %cst_8 [0] : vector<4x2x128xf32> to vector<2x128xf32>
    %23 = arith.subf %11, %22 : vector<2x128xf32>
    %cst_9 = arith.constant 0.000000e+00 : f32
    %24 = vector.broadcast %cst_9 : f32 to vector<2x128xf32>
    %25 = arith.subf %24, %23 : vector<2x128xf32>
    %26 = math.exp %25 : vector<2x128xf32>
    %cst_10 = arith.constant 0.699999988 : f32
    %27 = vector.broadcast %cst_10 : f32 to vector<2x128xf32>
    %28 = arith.cmpf olt, %26, %27 : vector<2x128xf32>
    %29 = arith.andi %13, %28 : vector<2x128xi1>
    %cst_11 = arith.constant 0.699999988 : f32
    %30 = vector.broadcast %cst_11 : f32 to vector<2x128xf32>
    %31 = arith.cmpf ole, %26, %30 : vector<2x128xf32>
    %32 = arith.andi %13, %31 : vector<2x128xi1>
    %cst_12 = arith.constant 0.000000e+00 : f32
    %33 = vector.broadcast %cst_12 : f32 to vector<2x128xf32>
    %34 = arith.select %29, %23, %33 : vector<2x128xi1>, vector<2x128xf32>
    %cst_13 = arith.constant dense<0.000000e+00> : vector<128xf32>
    %35 = vector.multi_reduction <add>, %34, %cst_13 [0] : vector<2x128xf32> to vector<128xf32>
    %36 = vector.shape_cast %35 : vector<128xf32> to vector<1x128xf32>
    %c0_14 = arith.constant 0 : index
    %c0_15 = arith.constant 0 : index
    %c0_16 = arith.constant 0 : index
    %c0_17 = arith.constant 0 : index
    %37 = vector.load %arg4[%c0_14, %c0_15, %c0_16, %c0_17] : memref<1x1x4x128xf32, #tpu.memory_space<vmem>>, vector<1x1x1x128xf32>
    %38 = vector.shape_cast %37 : vector<1x1x1x128xf32> to vector<1x128xf32>
    %39 = vector.shape_cast %36 : vector<1x128xf32> to vector<1x1x1x128xf32>
    tpu.vector_store %arg4[%c0_14, %c0_15, %c0_16, %c0_17], %39 {strides = array<i32>} : memref<1x1x4x128xf32, #tpu.memory_space<vmem>>, vector<1x1x1x128xf32>,
    %40 = arith.extui %29 : vector<2x128xi1> to vector<2x128xi32>
    %41 = arith.sitofp %40 : vector<2x128xi32> to vector<2x128xf32>
    %cst_18 = arith.constant dense<0.000000e+00> : vector<128xf32>
    %42 = vector.multi_reduction <add>, %41, %cst_18 [0] : vector<2x128xf32> to vector<128xf32>
    %43 = vector.shape_cast %42 : vector<128xf32> to vector<1x128xf32>
    %c0_19 = arith.constant 0 : index
    %c0_20 = arith.constant 0 : index
    %c1 = arith.constant 1 : index
    %c0_21 = arith.constant 0 : index
    %44 = vector.load %arg4[%c0_19, %c0_20, %c1, %c0_21] : memref<1x1x4x128xf32, #tpu.memory_space<vmem>>, vector<1x1x1x128xf32>
    %45 = vector.shape_cast %44 : vector<1x1x1x128xf32> to vector<1x128xf32>
    %46 = vector.shape_cast %43 : vector<1x128xf32> to vector<1x1x1x128xf32>
    tpu.vector_store %arg4[%c0_19, %c0_20, %c1, %c0_21], %46 {strides = array<i32>} : memref<1x1x4x128xf32, #tpu.memory_space<vmem>>, vector<1x1x1x128xf32>,
    %47 = arith.extui %32 : vector<2x128xi1> to vector<2x128xi32>
    %48 = arith.sitofp %47 : vector<2x128xi32> to vector<2x128xf32>
    %cst_22 = arith.constant dense<0.000000e+00> : vector<128xf32>
    %49 = vector.multi_reduction <add>, %48, %cst_22 [0] : vector<2x128xf32> to vector<128xf32>
    %50 = vector.shape_cast %49 : vector<128xf32> to vector<1x128xf32>
    %c0_23 = arith.constant 0 : index
    %c0_24 = arith.constant 0 : index
    %c2 = arith.constant 2 : index
    %c0_25 = arith.constant 0 : index
    %51 = vector.load %arg4[%c0_23, %c0_24, %c2, %c0_25] : memref<1x1x4x128xf32, #tpu.memory_space<vmem>>, vector<1x1x1x128xf32>
    %52 = vector.shape_cast %51 : vector<1x1x1x128xf32> to vector<1x128xf32>
    %53 = vector.shape_cast %50 : vector<1x128xf32> to vector<1x1x1x128xf32>
    tpu.vector_store %arg4[%c0_23, %c0_24, %c2, %c0_25], %53 {strides = array<i32>} : memref<1x1x4x128xf32, #tpu.memory_space<vmem>>, vector<1x1x1x128xf32>,
    %54 = arith.extui %13 : vector<2x128xi1> to vector<2x128xi32>
    %55 = arith.sitofp %54 : vector<2x128xi32> to vector<2x128xf32>
    %cst_26 = arith.constant dense<0.000000e+00> : vector<128xf32>
    %56 = vector.multi_reduction <add>, %55, %cst_26 [0] : vector<2x128xf32> to vector<128xf32>
    %57 = vector.shape_cast %56 : vector<128xf32> to vector<1x128xf32>
    %c0_27 = arith.constant 0 : index
    %c0_28 = arith.constant 0 : index
    %c3 = arith.constant 3 : index
    %c0_29 = arith.constant 0 : index
    %58 = vector.load %arg4[%c0_27, %c0_28, %c3, %c0_29] : memref<1x1x4x128xf32, #tpu.memory_space<vmem>>, vector<1x1x1x128xf32>
    %59 = vector.shape_cast %58 : vector<1x1x1x128xf32> to vector<1x128xf32>
    %60 = vector.shape_cast %57 : vector<1x128xf32> to vector<1x1x1x128xf32>
    tpu.vector_store %arg4[%c0_27, %c0_28, %c3, %c0_29], %60 {strides = array<i32>} : memref<1x1x4x128xf32, #tpu.memory_space<vmem>>, vector<1x1x1x128xf32>,
    return
  }
  func.func @transform_0(%arg0: i32, %arg1: i32) -> (i32, i32, i32, i32) {
    %c0_i32 = arith.constant 0 : i32
    %c0_i32_0 = arith.constant 0 : i32
    %c0_i32_1 = arith.constant 0 : i32
    return %arg0, %c0_i32, %arg1, %c0_i32_0 : i32, i32, i32, i32
  }
  func.func @transform_1(%arg0: i32, %arg1: i32) -> (i32, i32, i32) {
    %c0_i32 = arith.constant 0 : i32
    %c0_i32_0 = arith.constant 0 : i32
    return %arg0, %arg1, %c0_i32 : i32, i32, i32
  }
  func.func @transform_2(%arg0: i32, %arg1: i32) -> (i32, i32, i32, i32) {
    %c0_i32 = arith.constant 0 : i32
    %c0_i32_0 = arith.constant 0 : i32
    %c0_i32_1 = arith.constant 0 : i32
    return %arg0, %arg1, %c0_i32, %c0_i32_0 : i32, i32, i32, i32
  }
}

</mosaic_0001>

<bundles_post_ra>
// kernel: tpu_custom_call.1
= control target key start
LH: loop header
LB: loop body
LE: loop exit
PB: predicated region body
PF: predicated region fallthrough
CT: control target
= control target key end

     0   :  { %7 = vsyncpa [#allocation3], 0  ;;  %s887_s0 = inlined_call_operand.hbm [shape: f32[2,4,2,128], index: 0, kind: input, shape index: {}]   ;;  %s888_s1 = inlined_call_operand.hbm [shape: s32[2,2,128], index: 1, kind: input, shape index: {}]   ;;  %s889_s2 = inlined_call_operand.hbm [shape: f32[2,1,4,128], index: 2, kind: output, shape index: {}]  }
   0x1   :  { %9 = vsyncpa [#allocation3 + $0x1], 0 }
   0x2   :  { %10 = vsyncpa [#allocation6], 0 }
   0x3   :  { %12 = vsyncpa [#allocation6 + $0x1], 0 }
   0x4   :  { %13 = vsyncpa [#allocation4], 0 }
   0x5   :  { %15 = vsyncpa [#allocation4 + $0x1], 0  ;;  %s713_s9 = smov 0   ;;  %s715_s10 = smov 0  }
   0x6   :  { %s717_s11 = smov 0   ;;  %s719_s12 = smov 0  }
   0x7   :  { %s721_s13 = smov 0   ;;  %s723_s14 = smov 0  }
   0x8 LB: > { %s444_s15 = sadd.s32 4294967295, %s693_s14   ;;  %s445_s16 = sadd.s32 4294967294, %s693_s14   ;;  %s693_s14 = sphi %s723_s14, %s21_s14   ;;  %s689_s13 = sphi %s721_s13, %s899_s13   ;;  %s685_s12 = sphi %s719_s12, %s898_s12   ;;  %s681_s11 = sphi %s717_s11, %s897_s11   ;;  %s677_s10 = sphi %s715_s10, %s896_s10   ;;  %s673_s9 = sphi %s713_s9, %s895_s9  }
   0x9   : > { %s33_s17 = sadd.s32 1, %s689_s13  ;;  %s42_s18 = sadd.s32 1, %s681_s11 }
   0xa   : > { %p35_p0 = scmp.ge.s32.totalorder %s33_s17, 2  ;;  %p49_p1 = scmp.ne.s32.totalorder %s681_s11, %s677_s10 }
   0xb   : > { %p50_p2 = scmp.eq.s32.totalorder %s693_s14, 0  ;;  %p55_p3 = scmp.ne.s32.totalorder %s677_s10, %s673_s9 }
   0xc   : > { %s901_s17 = smov (%p35_p0, %s33_s17), 0  ;;  %p56_p5 = scmp.eq.s32.totalorder %s444_s15, 0 }
   0xd   : > { %p754_p4 = por %p50_p2, %p49_p1  ;;  %s37_s20 = ssub.s32 %s689_s13, %s901_s17 }
   0xe   : > { %p109_p6 = scmp.eq.s32.totalorder %s444_s15, 1  ;;  %p40_p7 = scmp.eq.s32.totalorder %s37_s20, 0 }
   0xf   : > { %p760_p8 = por %p56_p5, %p55_p3  ;;  %p115_p10 = scmp.eq.s32.totalorder %s445_s16, 1 }
  0x10   : > { %p764_p9 = por %p109_p6, %p49_p1  ;;  %p447_p12 = scmp.ge.s32.totalorder %s693_s14, 2 }
  0x11   : > { %s769_s23 = scalar_select %p40_p7, %s681_s11, %s42_s18  }
  0x12   : > { %p771_p11 = por %p115_p10, %p55_p3  ;;  %p482_p13 = scmp.lt.s32.totalorder %s693_s14, 2 }
  0x13   : > { %s135_s25 = sand.u32 1, %s681_s11   ;;  %s464_s27 = sshll.u32 %s689_s13, 3 }
  0x14   : > { %s448_s26 = sshll.u32 %s135_s25, 3  ;;  %s145_s30 = scalar_lea.hbm %s887_s0, %s464_s27 }
  0x15   : > { %s139_s3 = scalar_lea.vmem [#allocation2], %s448_s26  ;;  %s146_s5 = sshll.u32 %s145_s30, 4  ;;  %s147_s5 = int_to_ptr.hbm [resolvable:$true] %s146_s5 }
  0x16   : > { %s148_s4 = sshll.u32 %s139_s3, 4  ;;  %p784_p0 = pnand %p482_p13, %p754_p4  ;;  %s149_s4 = int_to_ptr.vmem [resolvable:$true] %s148_s4 }
  0x17   : > { %p453_p1 = scmp.ge.s32.totalorder %s693_s14, 1  ;;  %s136_s7 = scalar_lea.sflag [#allocation3], %s135_s25 }
  0x18   : > { %s695_s8 = smov 32   ;;  %s696_s15 = smov 2  }
  0x19   : > { %474 = dma.hbm_to_vmem [thread:$0]  (!%p784_p0), %s147_s5, 128, %s149_s4, %s136_s7, %s695_s8, %s695_s8, %s696_s15  }
  0x1a   : > { %p176_p2 = scmp.lt.s32.totalorder %s693_s14, 3  ;;  %s451_s16 = sshll.u32 %s135_s25, 1 }
  0x1b   : > { %s452_s18 = sshll.u32 %s689_s13, 1  ;;  %s162_s27 = scalar_lea.vmem [#allocation5], %s451_s16 }
  0x1c   : > { %p177_p3 = pnand %p453_p1, %p176_p2  ;;  %s167_s19 = scalar_lea.hbm %s888_s1, %s452_s18 }
  0x1d   : > { %s171_s28 = sshll.u32 %s162_s27, 4  ;;  %s169_s29 = sshll.u32 %s167_s19, 4  ;;  %s172_s28 = int_to_ptr.vmem [resolvable:$true] %s171_s28  ;;  %s170_s29 = int_to_ptr.hbm [resolvable:$true] %s169_s29 }
  0x1e   : > { %s159_s30 = scalar_lea.sflag [#allocation6], %s135_s25  ;;  %180 = sbr.rel (%p177_p3) target bundleno = 110 (0x6e), region = 28 }
  0x1f   : > { %477 = dma.hbm_to_vmem [thread:$0]  (!%p784_p0), %s170_s29, 32, %s172_s28, %s159_s30  }
  0x20   : > { %s799_s3 = sand.u32 (!%p177_p3), 1, %s677_s10  }
  0x21   : > { %s454_s4 = sshll.u32 (!%p177_p3), %s799_s3, 3  ;;  %s183_s5 = scalar_lea.sflag (!%p177_p3), [#allocation3], %s799_s3 }
  0x22   : > { %s186_s7 = scalar_lea.vmem (!%p177_p3), [#allocation2], %s454_s4 }
  0x23   : > { %660 = dma.done.wait (%p760_p8), %s183_s5, 128  }
  0x24   : > { %662 = vsyncadd (%p760_p8), %s183_s5, 4294967168  ;;  %s455_s25 = sshll.u32 %s799_s3, 1  ;;  %s193_s6 = scalar_lea.sflag [#allocation6], %s799_s3 }
  0x25   : > { %s196_s8 = scalar_lea.vmem [#allocation5], %s455_s25 }
  0x26   : > { %664 = dma.done.wait (%p760_p8), %s193_s6, 32  }
  0x27   : > { %666 = vsyncadd (%p760_p8), %s193_s6, 4294967264  ;;  %vm228_vm0 = vcmask 1041408   ;;  %v223_v0 = vld [vmem:[%s186_s7] sm:$0x3]  ;;  %v224_v1 = vld [vmem:[%s186_s7 + $0x2] sm:$0x3] }
  0x28   : > { %v225_v2 = vld [vmem:[%s186_s7 + $0x4] sm:$0x3]  ;;  %v226_v3 = vld [vmem:[%s186_s7 + $0x6] sm:$0x3]  ;;  %v229_v4 = vsel %vm228_vm0, %v223_v0, -inf  ;;  %v230_v5 = vsel %vm228_vm0, %v224_v1, -inf }
  0x29   : > { %v231_v6 = vsel %vm228_vm0, %v225_v2, -inf  ;;  %v232_v7 = vsel %vm228_vm0, %v226_v3, -inf  ;;  %v233_v8 = vmax.f32 %v229_v4, %v230_v5  ;;  %v817_v11 = vld [vmem:[%s196_s8] sm:$0x3]  ;;  %v697_v35 = vmov 0.0   ;;  %s456_s21 = sshll.u32 %s799_s3, 2 }
  0x2a   : > { %v234_v9 = vmax.f32 %v231_v6, %v232_v7  ;;  %vm258_vm1 = vcmp.ne.s32.totalorder %v817_v11, 4294967295  ;;  %s835_s15 = scalar_lea.vmem [#allocation7], %s456_s21  ;;  %s461_s16 = sshll.u32 %s685_s12, 2 }
  0x2b   : > { %v259_v20 = vsel %vm258_vm1, %v817_v11, 0  ;;  %v459_v36 = vsel %vm258_vm1, 1.0, %v697_v35  ;;  %s334_s26 = scalar_lea.hbm %s889_s2, %s461_s16  ;;  %s336_s19 = sshll.u32 %s835_s15, 4  ;;  %s337_s19 = int_to_ptr.vmem [resolvable:$true] %s336_s19 }
  0x2c   : > { %v235_v10 = vmax.f32 %v233_v8, %v234_v9  ;;  %vm260_vm2 = vcmp.eq.s32.totalorder %v259_v20, 0  ;;  %vm261_vm3 = vcmp.eq.s32.totalorder %v259_v20, 1  ;;  %vm262_vm4 = vcmp.eq.s32.totalorder %v259_v20, 2  ;;  %s338_s12 = sshll.u32 %s334_s26, 4  ;;  %s323_s27 = scalar_lea.sflag [#allocation4], %s799_s3  ;;  %s339_s12 = int_to_ptr.hbm [resolvable:$true] %s338_s12 }
  0x2d   : > { %v264_v26 = vsel %vm260_vm2, %v223_v0, 0.0  ;;  %v265_v27 = vsel %vm261_vm3, %v224_v1, 0.0  ;;  %v266_v37 = vsel %vm262_vm4, %v225_v2, 0.0  ;;  %v314_v38 = vsel %vm228_vm0, %v459_v36, 0.0  ;;  %s621_s28 = sshra.s32 %s339_s12, 4  ;;  %s627_s5 = scalar_lea.hbm %s889_s2, 8  ;;  %s622_s28 = int_to_ptr.hbm [resolvable:$true] %s621_s28 }
  0x2e   : > { %v236_v12 = vsub.f32 %v223_v0, %v235_v10  ;;  %v237_v13 = vsub.f32 %v224_v1, %v235_v10  ;;  %v238_v14 = vsub.f32 %v225_v2, %v235_v10  ;;  %v239_v15 = vsub.f32 %v226_v3, %v235_v10  ;;  %s623_s29 = scalar_lea.hbm %s622_s28, 4  ;;  %p628_p7 = scmp.lt.s32.totalorder %s622_s28, %s889_s2 }
  0x2f   : > { %v268_v33 = vsel %vm228_vm0, %v264_v26, 0.0  ;;  %v269_v34 = vsel %vm228_vm0, %v265_v27, 0.0  ;;  %vm263_vm5 = vcmp.eq.s32.totalorder %v259_v20, 3  ;;  %v315_v40 = vrot.slane %v314_v38, 4  ;;  %p624_p4 = scmp.ne.s32.totalorder %s622_s28, %s623_s29  ;;  %p629_p8 = scmp.lt.s32.totalorder %s627_s5, %s623_s29 }
  0x30   : > { %v240_v16 = vmul.f32 1.442695, %v236_v12  ;;  %v242_v17 = vmul.f32 1.442695, %v237_v13  ;;  %v244_v18 = vmul.f32 1.442695, %v238_v14  ;;  %v270_v41 = vadd.f32 %v269_v34, %v268_v33 }
  0x31   : > { %v246_v19 = vmul.f32 1.442695, %v239_v15  ;;  %v271_v42 = vsel %vm228_vm0, %v266_v37, 0.0  ;;  %v316_v43 = vadd.f32 %v315_v40, %v314_v38  ;;  %v267_v44 = vsel %vm263_vm5, %v226_v3, 0.0  ;;  %p625_p5 = pnand %p624_p4, %p764_p9  ;;  %p630_p10 = por %p629_p8, %p628_p7 }
  0x32   : > { %535 = vpow2.f32 %v240_v16  ;;  %v272_v46 = vadd.f32 %v271_v42, %v270_v41  ;;  %v273_v47 = vsel %vm228_vm0, %v267_v44, 0.0 }
  0x33   : > { %537 = vpow2.f32 %v242_v17  ;;  %v317_v45 = vrot.slane %v316_v43, 2  ;;  %p626_p6 = pneg %p625_p5 }
  0x34   : > { %539 = vpow2.f32 %v244_v18  ;;  %v274_v52 = vadd.f32 %v273_v47, %v272_v46 }
  0x35   : > { %541 = vpow2.f32 %v246_v19  ;;  %v318_v48 = vadd.f32 %v317_v45, %v316_v43  ;;  %p631_p13 = pnand %p630_p10, %p626_p6 }
  0x37   : > { %v319_v50 = vrot.slane %v318_v48, 1 }
  0x38   : > { %v536_v21 = vpop.eup %535 }
  0x39   : > { %v538_v22 = vpop.eup %537  ;;  %v248_v23 = vsel %vm228_vm0, %v536_v21, 0.0  ;;  %v320_v53 = vadd.f32 %v319_v50, %v318_v48 }
  0x3a   : > { %v540_v24 = vpop.eup %539  ;;  %v249_v25 = vsel %vm228_vm0, %v538_v22, 0.0 }
  0x3b   : > { %v542_v28 = vpop.eup %541  ;;  %v250_v29 = vadd.f32 %v249_v25, %v248_v23  ;;  %v251_v30 = vsel %vm228_vm0, %v540_v24, 0.0  ;;  %321 = vst [vmem:[%s835_s15 + $0x3] sm:$0x1] %v320_v53 }
  0x3c   : > { %v253_v31 = vsel %vm228_vm0, %v542_v28, 0.0 }
  0x3d   : > { %v252_v32 = vadd.f32 %v251_v30, %v250_v29 }
  0x3f   : > { %v254_v39 = vadd.f32 %v253_v31, %v252_v32 }
  0x41   : > { %543 = vlog2.f32 %v254_v39 }
  0x47   : > { %v544_v49 = vpop.eup %543 }
  0x48   : > { %v256_v51 = vmul.f32 0.6931472, %v544_v49 }
  0x4a   : > { %v257_v54 = vadd.f32 %v256_v51, %v235_v10 }
  0x4c   : > { %v275_v55 = vsub.f32 %v257_v54, %v274_v52 }
  0x4e   : > { %v276_v56 = vsub.f32 0.0, %v275_v55 }
  0x50   : > { %v277_v57 = vmul.f32 1.442695, %v276_v56 }
  0x52   : > { %545 = vpow2.f32 %v277_v57 }
  0x58   : > { %v546_v58 = vpop.eup %545 }
  0x59   : > { %vm279_vm6 = vcmp.lt.f32.partialorder %v546_v58, 0.7  ;;  %vm281_vm7 = vcmp.le.f32.partialorder %v546_v58, 0.7 }
  0x5a   : > { %vm280_vm8 = vmand %vm258_vm1, %vm279_vm6 }
  0x5b   : > { %v283_v59 = vsel %vm280_vm8, %v275_v55, 0.0  ;;  %v457_v60 = vsel %vm280_vm8, 1.0, %v697_v35  ;;  %vm282_vm9 = vmand %vm258_vm1, %vm281_vm7 }
  0x5c   : > { %v284_v61 = vsel %vm228_vm0, %v283_v59, 0.0  ;;  %v294_v62 = vsel %vm228_vm0, %v457_v60, 0.0  ;;  %v458_v63 = vsel %vm282_vm9, 1.0, %v697_v35 }
  0x5d   : > { %v285_v0 = vrot.slane %v284_v61, 4  ;;  %v295_v1 = vrot.slane %v294_v62, 4  ;;  %v304_v2 = vsel %vm228_vm0, %v458_v63, 0.0 }
  0x5e   : > { %v305_v3 = vrot.slane %v304_v2, 4 }
  0x5f   : > { %v286_v4 = vadd.f32 %v285_v0, %v284_v61  ;;  %v296_v5 = vadd.f32 %v295_v1, %v294_v62 }
  0x60   : > { %v306_v6 = vadd.f32 %v305_v3, %v304_v2 }
  0x61   : > { %v287_v7 = vrot.slane %v286_v4, 2  ;;  %v297_v8 = vrot.slane %v296_v5, 2 }
  0x62   : > { %v307_v9 = vrot.slane %v306_v6, 2 }
  0x63   : > { %v288_v10 = vadd.f32 %v287_v7, %v286_v4  ;;  %v298_v11 = vadd.f32 %v297_v8, %v296_v5 }
  0x64   : > { %v308_v12 = vadd.f32 %v307_v9, %v306_v6 }
  0x65   : > { %v289_v13 = vrot.slane %v288_v10, 1  ;;  %v299_v14 = vrot.slane %v298_v11, 1 }
  0x66   : > { %v309_v15 = vrot.slane %v308_v12, 1 }
  0x67   : > { %v290_v16 = vadd.f32 %v289_v13, %v288_v10  ;;  %v300_v17 = vadd.f32 %v299_v14, %v298_v11 }
  0x68   : > { %v310_v18 = vadd.f32 %v309_v15, %v308_v12 }
  0x69   : > { %291 = vst [vmem:[%s835_s15] sm:$0x1] %v290_v16 }
  0x6a   : > { %301 = vst [vmem:[%s835_s15 + $0x1] sm:$0x1] %v300_v17 }
  0x6b   : > { %311 = vst [vmem:[%s835_s15 + $0x2] sm:$0x1] %v310_v18 }
  0x6c   : > { %634 = shalt.err (!%p631_p13)
}
  0x6d   : > { %469 = dma.vmem_to_hbm [thread:$0]  (%p764_p9), %s337_s19, 64, %s339_s12, %s323_s27  }
  0x6e PF: > { %s350_s3 = sand.u32 1, %s673_s9   ;;  %p479_p0 = pnand %p447_p12, %p771_p11 }
  0x6f   : > { %s351_s6 = scalar_lea.sflag [#allocation4], %s350_s3 }
  0x70   : > { %p480_p1 = pneg %p479_p0 }
  0x72   : > { %668 = dma.done.wait (%p480_p1), %s351_s6, 64  }
  0x73   : > { %670 = vsyncadd (%p480_p1), %s351_s6, 4294967232  ;;  %s21_s14 = sadd.s32 1, %s693_s14   ;;  %s895_s9 = smov %s677_s10 }
  0x74   : > { %p18_p2 = scmp.ge.s32.totalorder %s21_s14, 4   ;;  %s896_s10 = smov %s681_s11 }
  0x75   : > { %s897_s11 = smov %s769_s23  ;;  %s898_s12 = smov %s689_s13 }
  0x76   : > { %s899_s13 = smov %s901_s17  ;;  %20 = sbr.rel (!%p18_p2) target bundleno = 8 (0x8), region = 86 }
  0x7b   :  { %357 = vsyncpa [#allocation3], 1 }
  0x7c   :  { %359 = vsyncpa [#allocation3 + $0x1], 1 }
  0x7d   :  { %360 = vsyncpa [#allocation6], 1 }
  0x7e   :  { %362 = vsyncpa [#allocation6 + $0x1], 1 }
  0x7f   :  { %363 = vsyncpa [#allocation4], 1 }
  0x80   :  { %365 = vsyncpa [#allocation4 + $0x1], 1 }

</bundles_post_ra>
